<compile_context>
chip_gen: v7x
topology: tpu7x:2x2x1
jax: 0.10.0
libtpu: 0.0.40
codegen_flags: <defaults>
</compile_context>

<pallas_src>
import functools

import jax
import jax.numpy as jnp
from jax.experimental import pallas as pl
from jax.experimental.pallas import tpu as pltpu


def _round_up(x, m):
    return (x + m - 1) // m * m


def _cdiv(a, b):
    return -(-a // b)


def _extract_patches_nchw(image, patch_size):
    """Non-overlapping patch_size x patch_size patches, flattened (C, ph, pw) row-major."""
    # TODO(synk): exact `extract_patches` from the original repo is not provided;
    # non-overlapping stride == patch_size is used here.
    n, c, h, w = image.shape
    p = patch_size
    x = image.reshape(n, c, h // p, p, w // p, p)
    x = x.transpose(0, 2, 4, 1, 3, 5)              # N, H/p, W/p, C, p, p
    return x.reshape(n * (h // p) * (w // p), c * p * p)


def _us_forward_kernel(label_ref, x_ref, w_ref, err_ref, unc_ref, y_ref, *,
                       num_students, d_pad):
    """One grid step processes a [tile_p, K_pad] patch tile.

    label_ref : SMEM (1,) int32     class label (used only by the index_maps)
    x_ref     : [tile_p, K_pad]     bf16 patches; column K holds 1.0 for real rows (bias lane)
    w_ref     : [1, K_pad, Nf_pad]  bf16 fused [teacher | students] weights (+bias row K)
    err_ref   : [8, d_pad] f32      per-lane partial sums of (mean_s - teacher)^2  (row 0 used)
    unc_ref   : [8, d_pad] f32      per-lane partial sums of sum_s (y_s - mean_s)^2 (row 0 used)
    y_ref     : [tile_p, Nf_pad]    f32 VMEM scratch holding the fused matmul output
    """
    i = pl.program_id(1)   # patch-tile (reduction) axis

    @pl.when(i == 0)
    def _init():
        err_ref[...] = jnp.zeros_like(err_ref)
        unc_ref[...] = jnp.zeros_like(unc_ref)

    # One wide MXU pass (bf16 in, f32 accumulate). Biases are folded into row K of the
    # weights via the ones-lane of x, so zero-padded patch rows yield exactly-zero
    # outputs and padded feature lanes are exact zeros — no masking needed anywhere.
    y_ref[...] = jnp.dot(x_ref[...], w_ref[0], preferred_element_type=jnp.float32)

    # Lane-aligned (128-multiple) static slices of the single fused buffer.
    teacher = y_ref[:, 0:d_pad]
    mean_s = y_ref[:, d_pad:2 * d_pad]
    for s in range(1, num_students):
        mean_s = mean_s + y_ref[:, (s + 1) * d_pad:(s + 2) * d_pad]
    mean_s = mean_s * (1.0 / float(num_students))

    # Per-lane partial sums only: the cross-lane reduce and the 1/(P*D), 1/(S-1)
    # scalings happen once in the wrapper (removes per-step XLU lane reduce + scalar RMW).
    sq = (mean_s - teacher) ** 2
    err_ref[0:1, :] += jnp.sum(sq, axis=0, keepdims=True)

    # Two-pass variance around the mean (matches torch.var, avoids cancellation).
    var = (y_ref[:, d_pad:2 * d_pad] - mean_s) ** 2
    for s in range(1, num_students):
        var = var + (y_ref[:, (s + 1) * d_pad:(s + 2) * d_pad] - mean_s) ** 2
    unc_ref[0:1, :] += jnp.sum(var, axis=0, keepdims=True)


def build_fused_params(wt, bt, ws_all, bs_all, num_classes, num_students):
    """Precompute (once — models are frozen) the per-class fused, padded, bf16 weight slab.

    Lane layout: [teacher | student 0 | ... | student S-1], each model padded to a multiple
    of 128 lanes so in-kernel per-model slices are lane-aligned; the fused total is padded
    to a multiple of 128 (not 256 — v5e's MXU is 128-wide and 256 adds dead columns here).
    Row K of the slab holds the biases (folded into the matmul via a ones-lane of x).
    Returns w_cat [C, K_pad, Nf_pad] bf16.
    """
    K, D = wt.shape
    k_pad = _round_up(K + 1, 128)          # +1: the ones-lane carrying the folded biases
    d_pad = _round_up(D, 128)
    nf_pad = _round_up((num_students + 1) * d_pad, 128)

    ws = ws_all.reshape(num_classes, num_students, K, D)
    bs = bs_all.reshape(num_classes, num_students, D)

    w_cat = jnp.zeros((num_classes, k_pad, nf_pad), jnp.float32)
    w_cat = w_cat.at[:, :K, :D].set(jnp.broadcast_to(wt, (num_classes, K, D)))
    w_cat = w_cat.at[:, K, :D].set(jnp.broadcast_to(bt, (num_classes, D)))
    for s in range(num_students):
        lo = (s + 1) * d_pad
        w_cat = w_cat.at[:, :K, lo:lo + D].set(ws[:, s])
        w_cat = w_cat.at[:, K, lo:lo + D].set(bs[:, s])
    return w_cat.astype(jnp.bfloat16)


def _vmem_budget_bytes(device_kind):
    k = device_kind.lower()
    if "v2" in k or "v3" in k:
        return 12 * 1024 * 1024
    if "7" in k:                      # v7x: 64 MiB physical VMEM per TensorCore
        return 48 * 1024 * 1024
    return 100 * 1024 * 1024          # v4/v5e/v5p/v6e: 128 MiB physical


def _default_tile_p(num_patches, k_pad, nf_pad, device_kind):
    """Largest 16-multiple patch tile that fits the per-generation VMEM budget."""
    gen_cap = 256 if "7" in device_kind.lower() else 512
    budget = _vmem_budget_bytes(device_kind)
    w_bytes = 2 * k_pad * nf_pad * 2               # weight slab, default double-buffered, bf16
    per_row = 2 * k_pad * 2 + nf_pad * 4           # x double-buffer (bf16) + y scratch (f32)
    if budget > w_bytes:
        cap = max(16, ((budget - w_bytes) // per_row) // 16 * 16)
    else:
        cap = 16
    return max(16, min(gen_cap, cap, _round_up(num_patches, 16)))


@functools.partial(jax.jit,
                   static_argnames=("num_students", "patch_size", "feat_dim", "tile_p"))
def class_conditional_us_forward(image, w_cat, label, *,
                                 num_students, patch_size, feat_dim, tile_p=None):
    """Returns (regression_error, predictive_uncertainty) as scalar f32 arrays."""
    if num_students < 2:
        # torch.var(dim=0) with default unbiased=True would be NaN/inf for a single student.
        raise ValueError("num_students must be >= 2 for the unbiased predictive uncertainty.")

    patches = _extract_patches_nchw(image, patch_size)      # [P, K] f32
    num_patches, K = patches.shape
    _, k_pad, nf_pad = w_cat.shape
    d_pad = _round_up(feat_dim, 128)
    assert K + 1 <= k_pad, "fused weight slab does not include the bias lane"

    device_kind = jax.local_devices()[0].device_kind
    if tile_p is None:
        tile_p = _default_tile_p(num_patches, k_pad, nf_pad, device_kind)
    tile_p = max(16, _round_up(int(tile_p), 16))

    # Leading "parallel" axis splits the patch-tile range in two (uses v7x's 2nd
    # TensorCore; a plain sequential loop on 1-TC chips). Only split when there is
    # more than one tile of real work.
    p_tiles = _cdiv(num_patches, tile_p)
    n_split = 2 if p_tiles >= 2 else 1
    tiles_per_split = _cdiv(p_tiles, n_split)
    p_pad = n_split * tiles_per_split * tile_p

    # Patch matrix with a trailing ones-lane (bias) for real rows; zero-padded rows get
    # a zero bias lane, so their matmul outputs are exactly zero (no row mask needed).
    # NOTE: this is still a wrapper-side HBM materialization; moving patch extraction
    # into the kernel is a possible further optimization at large P.
    x = jnp.concatenate([patches, jnp.ones((num_patches, 1), patches.dtype)], axis=1)
    x = jnp.pad(x.astype(jnp.bfloat16),
                ((0, p_pad - num_patches), (0, k_pad - (K + 1))))

    label_arr = jnp.asarray(label, dtype=jnp.int32).reshape((1,))

    kernel = functools.partial(_us_forward_kernel,
                               num_students=num_students, d_pad=d_pad)

    err_parts, unc_parts = pl.pallas_call(
        kernel,
        out_shape=(jax.ShapeDtypeStruct((n_split * 8, d_pad), jnp.float32),
                   jax.ShapeDtypeStruct((n_split * 8, d_pad), jnp.float32)),
        grid_spec=pltpu.PrefetchScalarGridSpec(
            num_scalar_prefetch=1,
            grid=(n_split, tiles_per_split),
            in_specs=[
                # patches: tiled over (split, tile) of the grid
                pl.BlockSpec((tile_p, k_pad),
                             lambda c, i, lbl: (c * tiles_per_split + i, 0)),
                # fused weights: class selected via the prefetched label; constant block
                # index across the whole grid -> DMA'd once, stays resident in VMEM.
                pl.BlockSpec((1, k_pad, nf_pad), lambda c, i, lbl: (lbl[0], 0, 0)),
            ],
            # Per-split resident accumulator blocks (revisited across the arbitrary axis).
            out_specs=(pl.BlockSpec((8, d_pad), lambda c, i, lbl: (c, 0)),
                       pl.BlockSpec((8, d_pad), lambda c, i, lbl: (c, 0))),
            scratch_shapes=[pltpu.VMEM((tile_p, nf_pad), jnp.float32)],
        ),
        compiler_params=pltpu.CompilerParams(
            dimension_semantics=("parallel", "arbitrary"),
            vmem_limit_bytes=_vmem_budget_bytes(device_kind)),
    )(label_arr, x, w_cat)

    # Final (tiny) reductions + scalings done once, outside the kernel.
    inv_count = 1.0 / float(num_patches * feat_dim)
    reg_err = jnp.sum(err_parts) * inv_count
    pred_unc = jnp.sum(unc_parts) * (inv_count / float(num_students - 1))
    return reg_err, pred_unc


def _reference(image, wt, bt, ws_all, bs_all, *, label, num_students, patch_size):
    """Pure-JAX reference with the same bf16-MXU / f32-accumulate numerics as the kernel."""
    patches = _extract_patches_nchw(image, patch_size)
    xb = patches.astype(jnp.bfloat16)

    def head(w, b):
        # bias participates as bf16 in the kernel (folded into the bf16 weight slab)
        return (jnp.dot(xb, w.astype(jnp.bfloat16), preferred_element_type=jnp.float32)
                + b.astype(jnp.bfloat16).astype(jnp.float32)[None, :])

    teacher = head(wt, bt)
    ws = ws_all[label * num_students:(label + 1) * num_students]
    bs = bs_all[label * num_students:(label + 1) * num_students]
    students = jnp.stack([head(ws[s], bs[s]) for s in range(num_students)], axis=0)
    mean_s = students.mean(axis=0)
    reg_err = jnp.mean((mean_s - teacher) ** 2)
    pred_unc = jnp.mean(jnp.var(students, axis=0, ddof=1))
    return reg_err, pred_unc


if __name__ == "__main__":
    # Small, module-consistent shapes (forward takes a single image).
    N, C, H, W = 1, 3, 24, 24
    patch_size = 4                     # divides H, W (non-overlapping patch extraction)
    D = 64                             # descriptor dimension
    num_students = 2                   # students per class (>=2 so unbiased var is defined)
    num_classes = 3
    label = 1

    K = C * patch_size * patch_size
    total_students = num_students * num_classes

    key = jax.random.PRNGKey(0)
    k_img, k_wt, k_bt, k_ws, k_bs = jax.random.split(key, 5)
    image = jax.random.normal(k_img, (N, C, H, W), dtype=jnp.float32)
    wt = jax.random.normal(k_wt, (K, D), dtype=jnp.float32) * 0.1
    bt = jax.random.normal(k_bt, (D,), dtype=jnp.float32) * 0.1
    ws_all = jax.random.normal(k_ws, (total_students, K, D), dtype=jnp.float32) * 0.1
    bs_all = jax.random.normal(k_bs, (total_students, D), dtype=jnp.float32) * 0.1

    # Frozen teacher/students -> fuse + fold biases + pad + cast once, outside the forward.
    w_cat = build_fused_params(wt, bt, ws_all, bs_all, num_classes, num_students)

    ref_err, ref_unc = _reference(image, wt, bt, ws_all, bs_all,
                                  label=label, num_students=num_students,
                                  patch_size=patch_size)

    # 1) default generation-tuned tile: the whole P=36 patch set fits in one grid step.
    reg_err, pred_unc = class_conditional_us_forward(
        image, w_cat, jnp.int32(label),
        num_students=num_students, patch_size=patch_size, feat_dim=D)
    reg_err, pred_unc = jax.block_until_ready((reg_err, pred_unc))
    assert jnp.allclose(reg_err, ref_err, rtol=1e-3, atol=1e-5), (reg_err, ref_err)
    assert jnp.allclose(pred_unc, ref_unc, rtol=1e-3, atol=1e-5), (pred_unc, ref_unc)

    # 2) small explicit tile: exercises multi-step accumulation, the 2-way parallel split
    #    and the padded (exactly-zero) last-tile rows produced by the bias-lane fold.
    reg_err2, pred_unc2 = class_conditional_us_forward(
        image, w_cat, jnp.int32(label),
        num_students=num_students, patch_size=patch_size, feat_dim=D, tile_p=16)
    reg_err2, pred_unc2 = jax.block_until_ready((reg_err2, pred_unc2))
    assert jnp.allclose(reg_err2, ref_err, rtol=1e-3, atol=1e-5), (reg_err2, ref_err)
    assert jnp.allclose(pred_unc2, ref_unc, rtol=1e-3, atol=1e-5), (pred_unc2, ref_unc)

    print("KERNEL_OK")
</pallas_src>

<mosaic_0001>
module attributes {stable_mosaic.version = 11 : i64} {
  func.func @_us_forward_kernel(%arg0: i32, %arg1: i32, %arg2: memref<1xi32, #tpu.memory_space<smem>>, %arg3: memref<48x128xbf16, #tpu.memory_space<vmem>>, %arg4: memref<1x128x384xbf16, #tpu.memory_space<vmem>>, %arg5: memref<8x128xf32, #tpu.memory_space<vmem>>, %arg6: memref<8x128xf32, #tpu.memory_space<vmem>>, %arg7: memref<48x384xf32, #tpu.memory_space<vmem>>) attributes {dimension_semantics = [#tpu.dimension_semantics<parallel>, #tpu.dimension_semantics<arbitrary>], iteration_bounds = array<i64: 1, 1>, scalar_prefetch = 1 : i64, scratch_operands = 1 : i64, tpu.core_type = #tpu.core_type<tc>, window_params = [{transform_indices = @transform_0, window_bounds = array<i64: 48, 128>}, {transform_indices = @transform_1, window_bounds = array<i64: 1, 128, 384>}, {transform_indices = @transform_2, window_bounds = array<i64: 8, 128>}, {transform_indices = @transform_3, window_bounds = array<i64: 8, 128>}]} {
    %c0_i32 = arith.constant 0 : i32
    %0 = arith.cmpi eq, %arg1, %c0_i32 : i32
    %1 = arith.extui %0 : i1 to i32
    %c0_i32_0 = arith.constant 0 : i32
    %2 = arith.cmpi ne, %1, %c0_i32_0 : i32
    scf.if %2 {
      %cst_26 = arith.constant 0.000000e+00 : f32
      %33 = vector.broadcast %cst_26 : f32 to vector<8x128xf32>
      %c0_27 = arith.constant 0 : index
      %c0_28 = arith.constant 0 : index
      %34 = vector.load %arg5[%c0_27, %c0_28] : memref<8x128xf32, #tpu.memory_space<vmem>>, vector<8x128xf32>
      tpu.vector_store %arg5[%c0_27, %c0_28], %33 {strides = array<i32>} : memref<8x128xf32, #tpu.memory_space<vmem>>, vector<8x128xf32>,
      %cst_29 = arith.constant 0.000000e+00 : f32
      %35 = vector.broadcast %cst_29 : f32 to vector<8x128xf32>
      %c0_30 = arith.constant 0 : index
      %c0_31 = arith.constant 0 : index
      %36 = vector.load %arg6[%c0_30, %c0_31] : memref<8x128xf32, #tpu.memory_space<vmem>>, vector<8x128xf32>
      tpu.vector_store %arg6[%c0_30, %c0_31], %35 {strides = array<i32>} : memref<8x128xf32, #tpu.memory_space<vmem>>, vector<8x128xf32>,
    } else {
    }
    %c0 = arith.constant 0 : index
    %c0_1 = arith.constant 0 : index
    %3 = vector.load %arg3[%c0, %c0_1] : memref<48x128xbf16, #tpu.memory_space<vmem>>, vector<48x128xbf16>
    %c0_2 = arith.constant 0 : index
    %c0_3 = arith.constant 0 : index
    %c0_4 = arith.constant 0 : index
    %4 = vector.load %arg4[%c0_2, %c0_3, %c0_4] : memref<1x128x384xbf16, #tpu.memory_space<vmem>>, vector<1x128x384xbf16>
    %5 = vector.shape_cast %4 : vector<1x128x384xbf16> to vector<128x384xbf16>
    %cst = arith.constant dense<0.000000e+00> : vector<48x384xf32>
    %6 = tpu.matmul %3, %5, %cst {dimension_numbers = #tpu.dot_dimension_numbers<[1], [0], [0], [1], [0, 0, 1, 1], [], []>} : vector<48x128xbf16>, vector<128x384xbf16>, vector<48x384xf32> -> vector<48x384xf32>
    %c0_5 = arith.constant 0 : index
    %c0_6 = arith.constant 0 : index
    %7 = vector.load %arg7[%c0_5, %c0_6] : memref<48x384xf32, #tpu.memory_space<vmem>>, vector<48x384xf32>
    tpu.vector_store %arg7[%c0_5, %c0_6], %6 {strides = array<i32>} : memref<48x384xf32, #tpu.memory_space<vmem>>, vector<48x384xf32>,
    %c0_7 = arith.constant 0 : index
    %c0_8 = arith.constant 0 : index
    %8 = vector.load %arg7[%c0_7, %c0_8] : memref<48x384xf32, #tpu.memory_space<vmem>>, vector<48x128xf32>
    %c0_9 = arith.constant 0 : index
    %c128 = arith.constant 128 : index
    %9 = vector.load %arg7[%c0_9, %c128] : memref<48x384xf32, #tpu.memory_space<vmem>>, vector<48x128xf32>
    %c0_10 = arith.constant 0 : index
    %c256 = arith.constant 256 : index
    %10 = vector.load %arg7[%c0_10, %c256] : memref<48x384xf32, #tpu.memory_space<vmem>>, vector<48x128xf32>
    %11 = arith.addf %9, %10 : vector<48x128xf32>
    %cst_11 = arith.constant 5.000000e-01 : f32
    %12 = vector.broadcast %cst_11 : f32 to vector<48x128xf32>
    %13 = arith.mulf %11, %12 : vector<48x128xf32>
    %14 = arith.subf %13, %8 : vector<48x128xf32>
    %15 = arith.mulf %14, %14 : vector<48x128xf32>
    %c0_12 = arith.constant 0 : index
    %c0_13 = arith.constant 0 : index
    %16 = vector.load %arg5[%c0_12, %c0_13] : memref<8x128xf32, #tpu.memory_space<vmem>>, vector<1x128xf32>
    %cst_14 = arith.constant dense<0.000000e+00> : vector<128xf32>
    %17 = vector.multi_reduction <add>, %15, %cst_14 [0] : vector<48x128xf32> to vector<128xf32>
    %18 = vector.shape_cast %17 : vector<128xf32> to vector<1x128xf32>
    %19 = arith.addf %16, %18 : vector<1x128xf32>
    %c0_15 = arith.constant 0 : index
    %c0_16 = arith.constant 0 : index
    %20 = vector.load %arg5[%c0_15, %c0_16] : memref<8x128xf32, #tpu.memory_space<vmem>>, vector<1x128xf32>
    tpu.vector_store %arg5[%c0_15, %c0_16], %19 {strides = array<i32>} : memref<8x128xf32, #tpu.memory_space<vmem>>, vector<1x128xf32>,
    %c0_17 = arith.constant 0 : index
    %c128_18 = arith.constant 128 : index
    %21 = vector.load %arg7[%c0_17, %c128_18] : memref<48x384xf32, #tpu.memory_space<vmem>>, vector<48x128xf32>
    %22 = arith.subf %21, %13 : vector<48x128xf32>
    %23 = arith.mulf %22, %22 : vector<48x128xf32>
    %c0_19 = arith.constant 0 : index
    %c256_20 = arith.constant 256 : index
    %24 = vector.load %arg7[%c0_19, %c256_20] : memref<48x384xf32, #tpu.memory_space<vmem>>, vector<48x128xf32>
    %25 = arith.subf %24, %13 : vector<48x128xf32>
    %26 = arith.mulf %25, %25 : vector<48x128xf32>
    %27 = arith.addf %23, %26 : vector<48x128xf32>
    %c0_21 = arith.constant 0 : index
    %c0_22 = arith.constant 0 : index
    %28 = vector.load %arg6[%c0_21, %c0_22] : memref<8x128xf32, #tpu.memory_space<vmem>>, vector<1x128xf32>
    %cst_23 = arith.constant dense<0.000000e+00> : vector<128xf32>
    %29 = vector.multi_reduction <add>, %27, %cst_23 [0] : vector<48x128xf32> to vector<128xf32>
    %30 = vector.shape_cast %29 : vector<128xf32> to vector<1x128xf32>
    %31 = arith.addf %28, %30 : vector<1x128xf32>
    %c0_24 = arith.constant 0 : index
    %c0_25 = arith.constant 0 : index
    %32 = vector.load %arg6[%c0_24, %c0_25] : memref<8x128xf32, #tpu.memory_space<vmem>>, vector<1x128xf32>
    tpu.vector_store %arg6[%c0_24, %c0_25], %31 {strides = array<i32>} : memref<8x128xf32, #tpu.memory_space<vmem>>, vector<1x128xf32>,
    return
  }
  func.func @transform_0(%arg0: i32, %arg1: i32, %arg2: memref<1xi32, #tpu.memory_space<smem>>) -> (i32, i32) {
    %c1_i32 = arith.constant 1 : i32
    %0 = arith.muli %arg0, %c1_i32 : i32
    %1 = arith.addi %0, %arg1 : i32
    %c0_i32 = arith.constant 0 : i32
    %c0_i32_0 = arith.constant 0 : i32
    return %1, %c0_i32 : i32, i32
  }
  func.func @transform_1(%arg0: i32, %arg1: i32, %arg2: memref<1xi32, #tpu.memory_space<smem>>) -> (i32, i32, i32) {
    %c0 = arith.constant 0 : index
    %0 = memref.load %arg2[%c0] : memref<1xi32, #tpu.memory_space<smem>>
    %c0_i32 = arith.constant 0 : i32
    %c0_i32_0 = arith.constant 0 : i32
    %c0_i32_1 = arith.constant 0 : i32
    return %0, %c0_i32, %c0_i32_0 : i32, i32, i32
  }
  func.func @transform_2(%arg0: i32, %arg1: i32, %arg2: memref<1xi32, #tpu.memory_space<smem>>) -> (i32, i32) {
    %c0_i32 = arith.constant 0 : i32
    %c0_i32_0 = arith.constant 0 : i32
    return %arg0, %c0_i32 : i32, i32
  }
  func.func @transform_3(%arg0: i32, %arg1: i32, %arg2: memref<1xi32, #tpu.memory_space<smem>>) -> (i32, i32) {
    %c0_i32 = arith.constant 0 : i32
    %c0_i32_0 = arith.constant 0 : i32
    return %arg0, %c0_i32 : i32, i32
  }
}

</mosaic_0001>

<bundles_post_ra>
// kernel: class_conditional_us_forward.1
= control target key start
LH: loop header
LB: loop body
LE: loop exit
PB: predicated region body
PF: predicated region fallthrough
CT: control target
= control target key end

     0   :  { %11 = vsyncpa [#allocation6], 0  ;;  %s844_s0 = inlined_call_operand.<no memory space> [shape: s32[1], index: 0, kind: input, shape index: {}]   ;;  %s845_s1 = inlined_call_operand.hbm [shape: bf16[48,128], index: 1, kind: input, shape index: {}]   ;;  %s846_s2 = inlined_call_operand.hbm [shape: bf16[3,128,384], index: 2, kind: input, shape index: {}]   ;;  %s847_s3 = inlined_call_operand.hbm [shape: f32[8,128], index: 3, kind: output, shape index: {0}]   ;;  %s848_s4 = inlined_call_operand.hbm [shape: f32[8,128], index: 4, kind: output, shape index: {1}]  }
   0x1   :  { %12 = vsyncpa [#allocation9], 0 }
   0x2   :  { %13 = vsyncpa [#allocation7], 0 }
   0x3   :  { %14 = vsyncpa [#allocation12], 0  ;;  %s741_s15 = smov [#allocation5]   ;;  %s596_s19 = smul.u32 3072, %s844_s0 }
   0x4   :  { %s24_s16 = sshll.u32 %s741_s15, 4  ;;  %s643_s22 = scalar_lea.hbm %s845_s1, 384  ;;  %s25_s16 = int_to_ptr.vmem [resolvable:$true] %s24_s16 }
   0x5   :  { %p644_p0 = scmp.ne.s32.totalorder %s845_s1, %s643_s22  ;;  %p647_p1 = scmp.lt.u32.totalorder %s643_s22, %s845_s1 }
   0x7   :  { %p649_p2 = pnand %p647_p1, %p644_p0 }
   0x9   :  { %652 = shalt.err (!%p649_p2)
}
   0xa   :  { %s653_s27 = scalar_lea.vmem %s25_s16, 384  ;;  %p658_p4 = scmp.lt.s32.totalorder %s25_s16, %s25_s16 }
   0xb   :  { %p654_p3 = scmp.ne.s32.totalorder %s25_s16, %s653_s27  ;;  %p659_p5 = scmp.lt.s32.totalorder %s653_s27, %s653_s27 }
   0xd   :  { %p660_p6 = por %p659_p5, %p658_p4 }
   0xf   :  { %p661_p7 = pnand %p660_p6, %p654_p3 }
  0x11   :  { %664 = shalt.err (!%p661_p7)
}
  0x12   :  { %s742_s0 = smov 64   ;;  %s743_s28 = smov 4  }
  0x13   :  { %30 = dma.hbm_to_vmem [thread:$0]  %s845_s1, 384, %s25_s16, [#allocation6], %s742_s0, %s742_s0, %s743_s28  }
  0x14   :  { %s39_s7 = scalar_lea.hbm %s846_s2, %s596_s19  ;;  %s744_s8 = smov [#allocation8]  }
  0x15   :  { %s40_s9 = sshll.u32 %s744_s8, 4  ;;  %s665_s10 = scalar_lea.hbm %s39_s7, 3072  ;;  %s41_s9 = int_to_ptr.vmem [resolvable:$true] %s40_s9 }
  0x16   :  { %p666_p8 = scmp.ne.s32.totalorder %s39_s7, %s665_s10  ;;  %s667_s13 = scalar_lea.hbm %s846_s2, 9216 }
  0x17   :  { %p668_p9 = scmp.lt.u32.totalorder %s39_s7, %s846_s2  ;;  %p669_p10 = scmp.lt.u32.totalorder %s667_s13, %s665_s10 }
  0x18   :  { %p671_p12 = scmp.lt.u32.totalorder %s665_s10, %s39_s7 }
  0x19   :  { %p670_p11 = por %p669_p10, %p668_p9 }
  0x1b   :  { %p672_p13 = por %p671_p12, %p670_p11 }
  0x1d   :  { %p673_p0 = pnand %p672_p13, %p666_p8 }
  0x1f   :  { %676 = shalt.err (!%p673_p0)
}
  0x20   :  { %s677_s1 = scalar_lea.vmem %s41_s9, 3072  ;;  %p682_p2 = scmp.lt.s32.totalorder %s41_s9, %s41_s9 }
  0x21   :  { %p678_p1 = scmp.ne.s32.totalorder %s41_s9, %s677_s1  ;;  %p683_p3 = scmp.lt.s32.totalorder %s677_s1, %s677_s1 }
  0x23   :  { %p684_p4 = por %p683_p3, %p682_p2 }
  0x25   :  { %p685_p5 = pnand %p684_p4, %p678_p1 }
  0x27   :  { %688 = shalt.err (!%p685_p5)
}
  0x28   :  { %s745_s16 = smov 192   ;;  %s746_s17 = smov 12  }
  0x29   :  { %46 = dma.hbm_to_vmem [thread:$0]  %s39_s7, 3072, %s41_s9, [#allocation9], %s745_s16, %s745_s16, %s746_s17  }
  0x2a   :  { %733 = dma.done.wait [#allocation6], 384  }
  0x2b   :  { %734 = vsyncadd [#allocation6], 4294966912 }
  0x2c   :  { %735 = dma.done.wait [#allocation9], 3072  }
  0x2d   :  { %736 = vsyncadd [#allocation9], 4294964224  ;;  %v747_v0 = vmov 0.0   ;;  %vm748_vm0 = vmmov 0   ;;  %v749_v1 = vmov 0   ;;  %v640_v26 = vld [vmem:[#allocation5] sm:$0xff]  }
  0x2e   :  { %568 = vmatprep.subr.bf16.mxu1 %v747_v0  ;;  %61 = vst [vmem:[#allocation10] sm:$0xff] %v747_v0  ;;  %62 = vst [vmem:[#allocation11] sm:$0xff] %v747_v0  ;;  %584 = vmatprep.mubr.msk.bf16.mxu1 %vm748_vm0, %v747_v0  ;;  %v608_v2 = vld [vmem:[#allocation8 + $0x4] ss:$12 sps:$4 sm:$0xff]   ;;  %v610_v3 = vld [vmem:[#allocation8 + $0x8] ss:$12 sps:$4 sm:$0xff]  }
  0x2f   :  { %279 = vmatprep.mubr.bf16.mxu0 %v749_v1  ;;  %247 = vmatprep.subr.bf16.mxu0 %v608_v2  ;;  %v611_v4 = vld [vmem:[#allocation8] ss:$12 sps:$4 sm:$0xff]   ;;  %v612_v5 = vld [vmem:[#allocation8 + $0x1c] ss:$12 sps:$4 sm:$0xff]   ;;  %v615_v7 = vld [vmem:[#allocation8 + $0x18] ss:$12 sps:$4 sm:$0xff]  }
  0x30   :  { %569 = vmatpush3.bf16.msra.mxu1 %v610_v3  ;;  %248 = vmatpush1.bf16.msra.mxu0 %v611_v4  ;;  %v614_v6 = vld [vmem:[#allocation8 + $0x20] ss:$12 sps:$4 sm:$0xff]   ;;  %v618_v9 = vld [vmem:[#allocation8 + $0x38] ss:$12 sps:$4 sm:$0xff]   ;;  %v619_v10 = vld [vmem:[#allocation8 + $0x30] ss:$12 sps:$4 sm:$0xff]  }
  0x31   :  { %570 = vmatprep.subr.bf16.mxu1 %v747_v0  ;;  %249 = vmatprep.subr.bf16.mxu0 %v612_v5  ;;  %v616_v8 = vld [vmem:[#allocation8 + $0x34] ss:$12 sps:$4 sm:$0xff]   ;;  %v620_v11 = vld [vmem:[#allocation8 + $0x4c] ss:$12 sps:$4 sm:$0xff]   ;;  %v622_v12 = vld [vmem:[#allocation8 + $0x50] ss:$12 sps:$4 sm:$0xff]  }
  0x32   :  { %v623_v13 = vld [vmem:[#allocation8 + $0x48] ss:$12 sps:$4 sm:$0xff]   ;;  %v624_v14 = vld [vmem:[#allocation8 + $0x64] ss:$12 sps:$4 sm:$0xff]   ;;  %v627_v16 = vld [vmem:[#allocation8 + $0x60] ss:$12 sps:$4 sm:$0xff]  }
  0x33   :  { %v626_v15 = vld [vmem:[#allocation8 + $0x68] ss:$12 sps:$4 sm:$0xff]   ;;  %v630_v18 = vld [vmem:[#allocation8 + $0x80] ss:$12 sps:$4 sm:$0xff]   ;;  %v631_v19 = vld [vmem:[#allocation8 + $0x78] ss:$12 sps:$4 sm:$0xff]  }
  0x34   :  { %571 = vmatpush3.bf16.msra.mxu1 %v614_v6  ;;  %250 = vmatpush1.bf16.msra.mxu0 %v615_v7  ;;  %v628_v17 = vld [vmem:[#allocation8 + $0x7c] ss:$12 sps:$4 sm:$0xff]   ;;  %v632_v20 = vld [vmem:[#allocation8 + $0x94] ss:$12 sps:$4 sm:$0xff]   ;;  %v634_v21 = vld [vmem:[#allocation8 + $0x98] ss:$12 sps:$4 sm:$0xff]  }
  0x35   :  { %572 = vmatprep.subr.bf16.mxu1 %v747_v0  ;;  %251 = vmatprep.subr.bf16.mxu0 %v616_v8  ;;  %v635_v22 = vld [vmem:[#allocation8 + $0x90] ss:$12 sps:$4 sm:$0xff]   ;;  %v636_v23 = vld [vmem:[#allocation8 + $0xac] ss:$12 sps:$4 sm:$0xff]   ;;  %v639_v25 = vld [vmem:[#allocation8 + $0xa8] ss:$12 sps:$4 sm:$0xff]  }
  0x36   :  { %v638_v24 = vld [vmem:[#allocation8 + $0xb0] ss:$12 sps:$4 sm:$0xff]   ;;  %s750_s2 = smov [#allocation10]   ;;  %s751_s19 = smov [#allocation11]  }
  0x37   :  { %v641_v27 = vld [vmem:[#allocation5 + $0x8] sm:$0xff]   ;;  %v642_v28 = vld [vmem:[#allocation5 + $0x10] sm:$0xff]   ;;  %s503_s18 = sshll.u32 %s750_s2, 4  ;;  %s513_s20 = sshll.u32 %s751_s19, 4  ;;  %s504_s18 = int_to_ptr.vmem [resolvable:$true] %s503_s18  ;;  %s514_s20 = int_to_ptr.vmem [resolvable:$true] %s513_s20 }
  0x38   :  { %573 = vmatpush3.bf16.msra.mxu1 %v618_v9  ;;  %252 = vmatpush1.bf16.msra.mxu0 %v619_v10  ;;  %s689_s21 = scalar_lea.vmem %s504_s18, 128  ;;  %p694_p7 = scmp.lt.s32.totalorder %s504_s18, %s504_s18 }
  0x39   :  { %574 = vmatprep.subr.bf16.mxu1 %v747_v0  ;;  %253 = vmatprep.subr.bf16.mxu0 %v620_v11  ;;  %p690_p6 = scmp.ne.s32.totalorder %s504_s18, %s689_s21  ;;  %p695_p8 = scmp.lt.s32.totalorder %s689_s21, %s689_s21 }
  0x3b   :  { %p696_p9 = por %p695_p8, %p694_p7 }
  0x3c   :  { %575 = vmatpush3.bf16.msra.mxu1 %v622_v12  ;;  %254 = vmatpush1.bf16.msra.mxu0 %v623_v13 }
  0x3d   :  { %576 = vmatprep.subr.bf16.mxu1 %v747_v0  ;;  %255 = vmatprep.subr.bf16.mxu0 %v624_v14  ;;  %p697_p10 = pnand %p696_p9, %p690_p6 }
  0x40   :  { %577 = vmatpush3.bf16.msra.mxu1 %v626_v15  ;;  %256 = vmatpush1.bf16.msra.mxu0 %v627_v16 }
  0x41   :  { %578 = vmatprep.subr.bf16.mxu1 %v747_v0  ;;  %257 = vmatprep.subr.bf16.mxu0 %v628_v17 }
  0x44   :  { %579 = vmatpush3.bf16.msra.mxu1 %v630_v18  ;;  %258 = vmatpush1.bf16.msra.mxu0 %v631_v19 }
  0x45   :  { %580 = vmatprep.subr.bf16.mxu1 %v747_v0  ;;  %259 = vmatprep.subr.bf16.mxu0 %v632_v20 }
  0x48   :  { %581 = vmatpush3.bf16.msra.mxu1 %v634_v21  ;;  %260 = vmatpush1.bf16.msra.mxu0 %v635_v22 }
  0x49   :  { %582 = vmatprep.subr.bf16.mxu1 %v747_v0  ;;  %261 = vmatprep.subr.bf16.mxu0 %v636_v23 }
  0x4c   :  { %583 = vmatpush3.bf16.msra.mxu1 %v638_v24  ;;  %262 = vmatpush1.bf16.msra.mxu0 %v639_v25 }
  0x4f   :  { %585 = vmatmul.mubr.bf16.vlgmr.msra.gmra.mrb[0].mxu1 %v640_v26  ;;  %280 = vmatmul.mubr.bf16.vlgmr.msra.gmra.mrb[0].mxu0 %v640_v26 }
  0x50   :  { %588 = vmatprep.mubr.msk.bf16.mxu1 %vm748_vm0, %v747_v0  ;;  %289 = vmatprep.mubr.bf16.mxu0 %v749_v1 }
  0x57   :  { %589 = vmatmul.mubr.bf16.gmra.mrb[4].mxu1 %v641_v27  ;;  %290 = vmatmul.mubr.bf16.gmra.mrb[4].mxu0 %v641_v27 }
  0x58   :  { %592 = vmatprep.mubr.msk.bf16.mxu1 %vm748_vm0, %v747_v0  ;;  %299 = vmatprep.mubr.bf16.mxu0 %v749_v1 }
  0x5f   :  { %593 = vmatmul.mubr.bf16.gmra.mrb[8].mxu1 %v642_v28  ;;  %300 = vmatmul.mubr.bf16.gmra.mrb[8].mxu0 %v642_v28 }
 0x122   :  { %v344_v29 = vpop.f32.mrb[0].mxu1  ;;  %v281_v30 = vpop.f32.mrb[0].mxu0 }
 0x123   :  { %v586_v31 = vpop.f32.mrb[1].mxu1  ;;  %v283_v32 = vpop.f32.mrb[1].mxu0 }
 0x124   :  { %v347_v33 = vpop.f32.mrb[2].mxu1  ;;  %v403_v34 = vadd.f32 %v344_v29, %v283_v32  ;;  %v285_v35 = vpop.f32.mrb[2].mxu0 }
 0x125   :  { %v587_v36 = vpop.f32.mrb[3].mxu1  ;;  %v287_v37 = vpop.f32.mrb[3].mxu0 }
 0x126   :  { %v409_v38 = vmul.f32 0.5, %v403_v34  ;;  %v404_v39 = vadd.f32 %v347_v33, %v287_v37 }
 0x128   :  { %v415_v40 = vsub.f32 %v409_v38, %v281_v30  ;;  %v447_v41 = vsub.f32 %v283_v32, %v409_v38  ;;  %v465_v42 = vsub.f32 %v344_v29, %v409_v38  ;;  %v410_v43 = vmul.f32 0.5, %v404_v39 }
 0x12a   :  { %v352_v44 = vpop.f32.mrb[4].mxu1  ;;  %v453_v45 = vmul.f32 %v447_v41, %v447_v41  ;;  %v471_v46 = vmul.f32 %v465_v42, %v465_v42  ;;  %v416_v47 = vsub.f32 %v410_v43, %v285_v35  ;;  %v291_v48 = vpop.f32.mrb[4].mxu0  ;;  %v448_v50 = vsub.f32 %v287_v37, %v410_v43 }
 0x12b   :  { %v590_v49 = vpop.f32.mrb[5].mxu1  ;;  %v466_v51 = vsub.f32 %v347_v33, %v410_v43  ;;  %v293_v52 = vpop.f32.mrb[5].mxu0  ;;  %v421_v54 = vmul.f32 %v415_v40, %v415_v40 }
 0x12c   :  { %v355_v53 = vpop.f32.mrb[6].mxu1  ;;  %v477_v55 = vadd.f32 %v471_v46, %v453_v45  ;;  %v422_v56 = vmul.f32 %v416_v47, %v416_v47  ;;  %v405_v57 = vadd.f32 %v352_v44, %v293_v52  ;;  %v295_v58 = vpop.f32.mrb[6].mxu0  ;;  %v454_v60 = vmul.f32 %v448_v50, %v448_v50 }
 0x12d   :  { %v591_v59 = vpop.f32.mrb[7].mxu1  ;;  %v472_v61 = vmul.f32 %v466_v51, %v466_v51  ;;  %v297_v62 = vpop.f32.mrb[7].mxu0 }
 0x12e   :  { %v428_v63 = vadd.f32 %v422_v56, %v421_v54  ;;  %v411_v0 = vmul.f32 0.5, %v405_v57  ;;  %v406_v1 = vadd.f32 %v355_v53, %v297_v62 }
 0x12f   :  { %v478_v2 = vadd.f32 %v472_v61, %v454_v60 }
 0x130   :  { %v417_v3 = vsub.f32 %v411_v0, %v291_v48  ;;  %v449_v4 = vsub.f32 %v293_v52, %v411_v0  ;;  %v467_v5 = vsub.f32 %v352_v44, %v411_v0  ;;  %v412_v6 = vmul.f32 0.5, %v406_v1 }
 0x131   :  { %v484_v7 = vadd.f32 %v478_v2, %v477_v55  ;;  %v483_v2 = vld [vmem:[#allocation11] sm:$0x1] }
 0x132   :  { %v360_v8 = vpop.f32.mrb[8].mxu1  ;;  %v423_v9 = vmul.f32 %v417_v3, %v417_v3  ;;  %v455_v10 = vmul.f32 %v449_v4, %v449_v4  ;;  %v473_v11 = vmul.f32 %v467_v5, %v467_v5  ;;  %v418_v12 = vsub.f32 %v412_v6, %v295_v58  ;;  %v301_v13 = vpop.f32.mrb[8].mxu0 }
 0x133   :  { %v594_v14 = vpop.f32.mrb[9].mxu1  ;;  %v450_v15 = vsub.f32 %v297_v62, %v412_v6  ;;  %v468_v16 = vsub.f32 %v355_v53, %v412_v6  ;;  %v303_v17 = vpop.f32.mrb[9].mxu0  ;;  %v427_v62 = vld [vmem:[#allocation10] sm:$0x1] }
 0x134   :  { %v363_v18 = vpop.f32.mrb[10].mxu1  ;;  %v429_v19 = vadd.f32 %v428_v63, %v423_v9  ;;  %v479_v20 = vadd.f32 %v473_v11, %v455_v10  ;;  %v424_v21 = vmul.f32 %v418_v12, %v418_v12  ;;  %v407_v22 = vadd.f32 %v360_v8, %v303_v17  ;;  %v305_v23 = vpop.f32.mrb[10].mxu0 }
 0x135   :  { %v595_v24 = vpop.f32.mrb[11].mxu1  ;;  %v456_v25 = vmul.f32 %v450_v15, %v450_v15  ;;  %v474_v26 = vmul.f32 %v468_v16, %v468_v16  ;;  %v307_v27 = vpop.f32.mrb[11].mxu0 }
 0x136   :  { %v485_v28 = vadd.f32 %v484_v7, %v479_v20  ;;  %v430_v29 = vadd.f32 %v429_v19, %v424_v21  ;;  %v413_v30 = vmul.f32 0.5, %v407_v22  ;;  %v408_v31 = vadd.f32 %v363_v18, %v307_v27 }
 0x137   :  { %v480_v32 = vadd.f32 %v474_v26, %v456_v25 }
 0x138   :  { %v419_v33 = vsub.f32 %v413_v30, %v301_v13  ;;  %v451_v34 = vsub.f32 %v303_v17, %v413_v30  ;;  %v469_v35 = vsub.f32 %v360_v8, %v413_v30  ;;  %v414_v36 = vmul.f32 0.5, %v408_v31 }
 0x139   :  { %v486_v37 = vadd.f32 %v485_v28, %v480_v32 }
 0x13a   :  { %v425_v38 = vmul.f32 %v419_v33, %v419_v33  ;;  %v457_v39 = vmul.f32 %v451_v34, %v451_v34  ;;  %v475_v40 = vmul.f32 %v469_v35, %v469_v35  ;;  %v420_v41 = vsub.f32 %v414_v36, %v305_v23 }
 0x13b   :  { %v452_v42 = vsub.f32 %v307_v27, %v414_v36  ;;  %v470_v43 = vsub.f32 %v363_v18, %v414_v36 }
 0x13c   :  { %v431_v44 = vadd.f32 %v430_v29, %v425_v38  ;;  %v481_v45 = vadd.f32 %v475_v40, %v457_v39  ;;  %v426_v46 = vmul.f32 %v420_v41, %v420_v41 }
 0x13d   :  { %v458_v47 = vmul.f32 %v452_v42, %v452_v42  ;;  %v476_v48 = vmul.f32 %v470_v43, %v470_v43 }
 0x13e   :  { %v487_v49 = vadd.f32 %v486_v37, %v481_v45  ;;  %v432_v50 = vadd.f32 %v431_v44, %v426_v46 }
 0x13f   :  { %v482_v51 = vadd.f32 %v476_v48, %v458_v47 }
 0x140   :  { %v433_v52 = vrot.slane %v432_v50, 4 }
 0x141   :  { %v488_v53 = vadd.f32 %v487_v49, %v482_v51 }
 0x142   :  { %v434_v54 = vadd.f32 %v433_v52, %v432_v50 }
 0x143   :  { %v489_v55 = vrot.slane %v488_v53, 4 }
 0x144   :  { %v435_v56 = vrot.slane %v434_v54, 2 }
 0x145   :  { %v490_v57 = vadd.f32 %v489_v55, %v488_v53 }
 0x146   :  { %v436_v58 = vadd.f32 %v435_v56, %v434_v54 }
 0x147   :  { %v491_v59 = vrot.slane %v490_v57, 2 }
 0x148   :  { %v437_v60 = vrot.slane %v436_v58, 1 }
 0x149   :  { %v492_v61 = vadd.f32 %v491_v59, %v490_v57 }
 0x14a   :  { %v438_v63 = vadd.f32 %v437_v60, %v436_v58 }
 0x14b   :  { %v493_v0 = vrot.slane %v492_v61, 1 }
 0x14c   :  { %v439_v1 = vadd.f32 %v438_v63, %v427_v62 }
 0x14d   :  { %v494_v3 = vadd.f32 %v493_v0, %v492_v61 }
 0x14e   :  { %440 = vst [vmem:[#allocation10] sm:$0x1] %v439_v1 }
 0x14f   :  { %700 = shalt.err (!%p697_p10)
}
 0x150   :  { %s701_s24 = scalar_lea.hbm %s847_s3, 128 }
 0x151   :  { %p702_p11 = scmp.ne.s32.totalorder %s847_s3, %s701_s24  ;;  %p705_p12 = scmp.lt.u32.totalorder %s701_s24, %s847_s3 }
 0x153   :  { %p707_p13 = pnand %p705_p12, %p702_p11 }
 0x155   :  { %710 = shalt.err (!%p707_p13)
}
 0x156   :  { %506 = dma.vmem_to_hbm [thread:$0]  %s504_s18, 128, %s847_s3, [#allocation7]   ;;  %v495_v4 = vadd.f32 %v494_v3, %v483_v2 }
 0x157   :  { %s711_s30 = scalar_lea.vmem %s514_s20, 128  ;;  %p716_p1 = scmp.lt.s32.totalorder %s514_s20, %s514_s20 }
 0x158   :  { %496 = vst [vmem:[#allocation11] sm:$0x1] %v495_v4  ;;  %p712_p0 = scmp.ne.s32.totalorder %s514_s20, %s711_s30  ;;  %p717_p2 = scmp.lt.s32.totalorder %s711_s30, %s711_s30 }
 0x15a   :  { %p718_p3 = por %p717_p2, %p716_p1 }
 0x15c   :  { %p719_p4 = pnand %p718_p3, %p712_p0 }
 0x15e   :  { %722 = shalt.err (!%p719_p4)
}
 0x15f   :  { %s723_s7 = scalar_lea.hbm %s848_s4, 128 }
 0x160   :  { %p724_p5 = scmp.ne.s32.totalorder %s848_s4, %s723_s7  ;;  %p727_p6 = scmp.lt.u32.totalorder %s723_s7, %s848_s4 }
 0x162   :  { %p729_p7 = pnand %p727_p6, %p724_p5 }
 0x164   :  { %732 = shalt.err (!%p729_p7)
}
 0x165   :  { %516 = dma.vmem_to_hbm [thread:$0]  %s514_s20, 128, %s848_s4, [#allocation12]  }
 0x166   :  { %737 = dma.done.wait [#allocation7], 128  }
 0x167   :  { %738 = vsyncadd [#allocation7], 4294967168 }
 0x168   :  { %739 = dma.done.wait [#allocation12], 128  }
 0x169   :  { %740 = vsyncadd [#allocation12], 4294967168 }
 0x16a   :  { %523 = vsyncpa [#allocation6], 1 }
 0x16b   :  { %524 = vsyncpa [#allocation9], 1 }
 0x16c   :  { %525 = vsyncpa [#allocation7], 1 }
 0x16d   :  { %526 = vsyncpa [#allocation12], 1 }

</bundles_post_ra>
